<compile_context>
chip_gen: v6e
topology: v6e:2x2x1
jax: 0.10.0
libtpu: 0.0.40
codegen_flags: <defaults>
</compile_context>

<pallas_src>
import functools

import jax
import jax.numpy as jnp
from jax.experimental import pallas as pl
from jax.experimental.pallas import tpu as pltpu


_BN_EPS = 1e-5
_NORM_EPS_SQ = 1e-24   # (1e-12)^2 -- F.normalize clamps the norm at 1e-12


# ---------------------------------------------------------------------------
# VMEM budget / tile selection helpers.
# ---------------------------------------------------------------------------
def _vmem_budget_bytes():
    """~80% of this generation's per-TensorCore VMEM (64 MiB v7x, 128 MiB v5e/v6e)."""
    try:
        cap = int(pltpu.get_tpu_info().vmem_capacity_bytes)
    except Exception:
        cap = 64 * 1024 * 1024          # conservative fallback (v7x-sized)
    return int(cap * 0.8)


def _pick_tn(n_out, prefs=(512, 256, 128)):
    """Largest lane-dense output tile, preferring >=2 grid steps on the
    'parallel' axis so both v7x TensorCores get work."""
    for t in prefs:
        if n_out % t == 0 and n_out // t >= 2:
            return t
    for t in prefs:
        if n_out % t == 0:
            return t
    return n_out


def _pick_tile(dim, preferred):
    for t in preferred:
        if dim % t == 0:
            return t
    return dim


# ---------------------------------------------------------------------------
# Shared BN(+ReLU) epilogue (f32 math).
# ---------------------------------------------------------------------------
def _bn_relu_epilogue(y, g_ref, beta_ref, apply_bn, apply_relu, eps):
    if apply_bn:
        # Batch stats over the FULL batch (the whole batch is inside every
        # N tile by construction -- see the x BlockSpec below).
        inv_n = 1.0 / y.shape[0]
        mean = jnp.sum(y, axis=0, keepdims=True) * inv_n
        ex2 = jnp.sum(y * y, axis=0, keepdims=True) * inv_n
        var = jnp.maximum(ex2 - mean * mean, 0.0)      # clamp f32 cancellation
        scale = jax.lax.rsqrt(var + eps) * g_ref[...].astype(jnp.float32)
        y = (y - mean) * scale + beta_ref[...].astype(jnp.float32)
    if apply_relu:
        y = jnp.maximum(y, 0.0)
    return y


# ---------------------------------------------------------------------------
# Fused Linear (+ bias) (+ BatchNorm1d) (+ ReLU).
#
# Full-K path (preferred): grid = (N_tiles,), x resident in VMEM, single MXU
# matmul per tile, epilogue inline -- no accumulator scratch, no K gating.
# Tiled-K fallback: grid = (N_tiles, K_tiles) with f32 accumulator scratch.
# ---------------------------------------------------------------------------
def _linear_full_k_kernel(x_ref, w_ref, b_ref, *rest,
                          apply_bn, apply_relu, eps):
    if apply_bn:
        g_ref, beta_ref, o_ref = rest
    else:
        g_ref = beta_ref = None
        (o_ref,) = rest
    y = jnp.dot(x_ref[...], w_ref[...], preferred_element_type=jnp.float32)
    y = y + b_ref[...].astype(jnp.float32)
    y = _bn_relu_epilogue(y, g_ref, beta_ref, apply_bn, apply_relu, eps)
    o_ref[...] = y.astype(o_ref.dtype)


def _linear_tiled_k_kernel(x_ref, w_ref, b_ref, *rest,
                           apply_bn, apply_relu, eps):
    if apply_bn:
        g_ref, beta_ref, o_ref, acc_ref = rest
    else:
        g_ref = beta_ref = None
        o_ref, acc_ref = rest
    k = pl.program_id(1)

    @pl.when(k == 0)
    def _():
        acc_ref[...] = jnp.zeros_like(acc_ref)

    acc_ref[...] += jnp.dot(x_ref[...], w_ref[...],
                            preferred_element_type=jnp.float32)

    @pl.when(k == pl.num_programs(1) - 1)
    def _():
        y = acc_ref[...] + b_ref[...].astype(jnp.float32)
        y = _bn_relu_epilogue(y, g_ref, beta_ref, apply_bn, apply_relu, eps)
        o_ref[...] = y.astype(o_ref.dtype)


def linear_bn_act(x, w, b, gamma=None, beta=None, *, apply_bn, apply_relu,
                  out_dtype=None):
    """One fused Linear(+BN)(+ReLU) layer as a tiled pallas_call."""
    n_batch, k_dim = x.shape
    k_dim2, n_out = w.shape
    assert k_dim == k_dim2
    if apply_bn:
        assert gamma is not None and beta is not None
    out_dtype = x.dtype if out_dtype is None else out_dtype

    x_bytes = jnp.dtype(x.dtype).itemsize
    w_bytes = jnp.dtype(w.dtype).itemsize
    o_bytes = jnp.dtype(out_dtype).itemsize

    budget = _vmem_budget_bytes()
    tn = _pick_tn(n_out)
    n_param_streams = 3 if apply_bn else 1       # bias (+ gamma, beta)

    # ---- full-K VMEM estimate: x resident (count 2x to be safe), W / params /
    #      out double-buffered, plus headroom for the f32 epilogue temps.
    full_k_est = (2 * n_batch * k_dim * x_bytes
                  + 2 * k_dim * tn * w_bytes
                  + 2 * n_param_streams * tn * 4
                  + 2 * n_batch * tn * o_bytes
                  + 2 * n_batch * tn * 4)
    use_full_k = full_k_est <= budget

    operands = (x, w, b) + ((gamma, beta) if apply_bn else ())
    param_spec = lambda j, *_: (0, j)

    if use_full_k:
        grid = (n_out // tn,)
        # NOTE: the x block holds the FULL batch (BN-stat correctness) and the
        # FULL K dim; its block index is constant so it stays resident in VMEM
        # across the whole grid (no per-tile re-DMA of the activation).
        in_specs = [pl.BlockSpec((n_batch, k_dim), lambda j: (0, 0)),   # x
                    pl.BlockSpec((k_dim, tn),      lambda j: (0, j))]   # W
        in_specs += [pl.BlockSpec((1, tn), param_spec)] * n_param_streams
        out_specs = pl.BlockSpec((n_batch, tn), lambda j: (0, j))
        scratch_shapes = []
        dim_sem = ("parallel",)
        kernel = functools.partial(_linear_full_k_kernel, apply_bn=apply_bn,
                                   apply_relu=apply_relu, eps=_BN_EPS)
        x_reads = 1
        vmem_est = full_k_est
    else:
        # Fallback for K too large to keep resident: reduce over a K grid
        # axis with an f32 accumulator in VMEM scratch.
        tk = _pick_tile(k_dim, (512, 256, 128))
        grid = (n_out // tn, k_dim // tk)
        in_specs = [pl.BlockSpec((n_batch, tk), lambda j, k: (0, k)),   # x
                    pl.BlockSpec((tk, tn),      lambda j, k: (k, j))]   # W
        in_specs += [pl.BlockSpec((1, tn), param_spec)] * n_param_streams
        out_specs = pl.BlockSpec((n_batch, tn), lambda j, k: (0, j))
        scratch_shapes = [pltpu.VMEM((n_batch, tn), jnp.float32)]
        dim_sem = ("parallel", "arbitrary")
        kernel = functools.partial(_linear_tiled_k_kernel, apply_bn=apply_bn,
                                   apply_relu=apply_relu, eps=_BN_EPS)
        x_reads = n_out // tn
        vmem_est = (2 * (n_batch * tk * x_bytes + tk * tn * w_bytes
                         + n_param_streams * tn * 4 + n_batch * tn * o_bytes)
                    + n_batch * tn * 4)

    vmem_limit = int(min(budget, max(2 * vmem_est, 32 * 1024 * 1024)))

    param_bytes = b.size * 4 + (gamma.size * 4 + beta.size * 4 if apply_bn else 0)
    cost = pl.CostEstimate(
        flops=2 * n_batch * k_dim * n_out,
        transcendentals=0,
        bytes_accessed=(x.size * x_bytes * x_reads + w.size * w_bytes
                        + param_bytes + n_batch * n_out * o_bytes),
    )

    return pl.pallas_call(
        kernel,
        out_shape=jax.ShapeDtypeStruct((n_batch, n_out), out_dtype),
        grid_spec=pltpu.PrefetchScalarGridSpec(
            num_scalar_prefetch=0,
            grid=grid,
            in_specs=in_specs,
            out_specs=out_specs,
            scratch_shapes=scratch_shapes,
        ),
        compiler_params=pltpu.CompilerParams(
            dimension_semantics=dim_sem,
            vmem_limit_bytes=vmem_limit,
        ),
        cost_estimate=cost,
    )(*operands)


# ---------------------------------------------------------------------------
# Row-wise L2 normalize (F.normalize) of z and p, stored directly into the
# two halves of the concat output (no concatenate temp; rsqrt on the EUP).
# ---------------------------------------------------------------------------
def _l2norm_cat_kernel(z_ref, p_ref, o_ref, *, d):
    z = z_ref[...].astype(jnp.float32)
    p = p_ref[...].astype(jnp.float32)
    z_scale = jax.lax.rsqrt(
        jnp.maximum(jnp.sum(z * z, axis=-1, keepdims=True), _NORM_EPS_SQ))
    p_scale = jax.lax.rsqrt(
        jnp.maximum(jnp.sum(p * p, axis=-1, keepdims=True), _NORM_EPS_SQ))
    o_ref[:, :d] = (z * z_scale).astype(o_ref.dtype)
    o_ref[:, d:] = (p * p_scale).astype(o_ref.dtype)


def l2_normalize_concat(z, p, out_dtype=jnp.float32):
    n, d = z.shape
    assert p.shape == (n, d)
    kernel = functools.partial(_l2norm_cat_kernel, d=d)
    return pl.pallas_call(
        kernel,
        out_shape=jax.ShapeDtypeStruct((n, 2 * d), out_dtype),
        in_specs=[pl.BlockSpec((n, d), lambda: (0, 0)),
                  pl.BlockSpec((n, d), lambda: (0, 0))],
        out_specs=pl.BlockSpec((n, 2 * d), lambda: (0, 0)),
    )(z, p)


# ---------------------------------------------------------------------------
# Parameter init (PyTorch-style Linear init; BN gamma=1, beta=0).
# Weights stored as bf16 (MXU-native, halves the weight-stream HBM bytes);
# bias/BN math stays in f32 in the epilogue.
# ---------------------------------------------------------------------------
def _init_linear(key, din, dout, w_dtype=jnp.bfloat16):
    kw, kb = jax.random.split(key)
    bound = 1.0 / float(din) ** 0.5
    w = jax.random.uniform(kw, (din, dout), jnp.float32, -bound, bound)
    b = jax.random.uniform(kb, (1, dout), jnp.float32, -bound, bound)
    return w.astype(w_dtype), b


def init_projection_mlp(key, in_dim, hidden_dim, out_dim):
    # The PyTorch module declares BatchNorm1d(hidden_dim) on layer3's out_dim
    # output; it only type-checks when out_dim == hidden_dim. Keep + assert.
    assert out_dim == hidden_dim, "projection_MLP requires out_dim == hidden_dim"
    k1, k2, k3 = jax.random.split(key, 3)
    p = {}
    p["w1"], p["b1"] = _init_linear(k1, in_dim, hidden_dim)
    p["g1"] = jnp.ones((1, hidden_dim), jnp.float32)
    p["be1"] = jnp.zeros((1, hidden_dim), jnp.float32)
    p["w2"], p["b2"] = _init_linear(k2, hidden_dim, hidden_dim)
    p["g2"] = jnp.ones((1, hidden_dim), jnp.float32)
    p["be2"] = jnp.zeros((1, hidden_dim), jnp.float32)
    p["w3"], p["b3"] = _init_linear(k3, hidden_dim, out_dim)
    p["g3"] = jnp.ones((1, out_dim), jnp.float32)
    p["be3"] = jnp.zeros((1, out_dim), jnp.float32)
    return p


def init_prediction_mlp(key, in_dim, hidden_dim, out_dim):
    k1, k2 = jax.random.split(key)
    p = {}
    p["w1"], p["b1"] = _init_linear(k1, in_dim, hidden_dim)
    p["g1"] = jnp.ones((1, hidden_dim), jnp.float32)
    p["be1"] = jnp.zeros((1, hidden_dim), jnp.float32)
    p["w2"], p["b2"] = _init_linear(k2, hidden_dim, out_dim)
    return p


def init_head_params(key, feat_dim, proj_hidden, proj_out, pred_hidden):
    kp, kq = jax.random.split(key)
    return {
        "proj": init_projection_mlp(kp, feat_dim, proj_hidden, proj_out),
        "pred": init_prediction_mlp(kq, proj_out, pred_hidden, proj_out),
    }


# ---------------------------------------------------------------------------
# Forward passes.
# ---------------------------------------------------------------------------
def projection_mlp_forward(p, x, num_layers=3):
    if num_layers == 3:
        x = linear_bn_act(x, p["w1"], p["b1"], p["g1"], p["be1"],
                          apply_bn=True, apply_relu=True)
        x = linear_bn_act(x, p["w2"], p["b2"], p["g2"], p["be2"],
                          apply_bn=True, apply_relu=True)
        x = linear_bn_act(x, p["w3"], p["b3"], p["g3"], p["be3"],
                          apply_bn=True, apply_relu=False)
    elif num_layers == 2:
        x = linear_bn_act(x, p["w1"], p["b1"], p["g1"], p["be1"],
                          apply_bn=True, apply_relu=True)
        x = linear_bn_act(x, p["w3"], p["b3"], p["g3"], p["be3"],
                          apply_bn=True, apply_relu=False)
    else:
        raise Exception
    return x


def prediction_mlp_forward(p, x):
    x = linear_bn_act(x, p["w1"], p["b1"], p["g1"], p["be1"],
                      apply_bn=True, apply_relu=True)
    # Output fc: no BN, no ReLU (per SimSiam); no dummy gamma/beta streams.
    x = linear_bn_act(x, p["w2"], p["b2"],
                      apply_bn=False, apply_relu=False)
    return x


def resnet_ibn_head_forward(params, feat, training=True):
    """ResNetIBN head: z = projection(feat); p = prediction(z); cat(norm)."""
    x = feat.astype(jnp.bfloat16)               # bf16 activations into the MXU
    z = projection_mlp_forward(params["proj"], x)
    p = prediction_mlp_forward(params["pred"], z)
    out = l2_normalize_concat(z, p, out_dtype=jnp.float32)
    if not training:
        out = out[: feat.shape[0] // 2, :]
    return out


if __name__ == "__main__":
    # Small shapes consistent with the module head (scaled down from
    # projection_MLP(2048, 2048, 2048) / prediction_MLP(2048, 512, 2048)).
    # Batch is a multiple of 16 so bf16 rows fully pack the MXU sublanes.
    batch = 16
    feat_dim = 256          # pooled backbone feature dim (stand-in for 2048)
    proj_hidden = proj_out = 256
    pred_hidden = 128       # bottleneck hidden of the prediction MLP

    key = jax.random.PRNGKey(0)
    kx, kp = jax.random.split(key)
    feat = jax.random.normal(kx, (batch, feat_dim), jnp.float32)
    params = init_head_params(kp, feat_dim, proj_hidden, proj_out, pred_hidden)

    out = resnet_ibn_head_forward(params, feat, training=True)
    jax.block_until_ready(out)

    assert out.shape == (batch, 2 * proj_out)
    assert bool(jnp.all(jnp.isfinite(out)))
    print("KERNEL_OK")
</pallas_src>

<mosaic_0001>
module attributes {stable_mosaic.version = 11 : i64} {
  func.func @_linear_full_k_kernel(%arg0: i32, %arg1: memref<16x256xbf16, #tpu.memory_space<vmem>>, %arg2: memref<256x128xbf16, #tpu.memory_space<vmem>>, %arg3: memref<1x128xf32, #tpu.memory_space<vmem>>, %arg4: memref<1x128xf32, #tpu.memory_space<vmem>>, %arg5: memref<1x128xf32, #tpu.memory_space<vmem>>, %arg6: memref<16x128xbf16, #tpu.memory_space<vmem>>) attributes {dimension_semantics = [#tpu.dimension_semantics<parallel>], iteration_bounds = array<i64: 2>, scalar_prefetch = 0 : i64, scratch_operands = 0 : i64, tpu.core_type = #tpu.core_type<tc>, window_params = [{pipeline_mode = #tpu.pipeline_mode<synchronous>, transform_indices = @transform_0, window_bounds = array<i64: 16, 256>}, {transform_indices = @transform_1, window_bounds = array<i64: 256, 128>}, {transform_indices = @transform_2, window_bounds = array<i64: 1, 128>}, {transform_indices = @transform_3, window_bounds = array<i64: 1, 128>}, {transform_indices = @transform_4, window_bounds = array<i64: 1, 128>}, {transform_indices = @transform_5, window_bounds = array<i64: 16, 128>}]} {
    %c0 = arith.constant 0 : index
    %c0_0 = arith.constant 0 : index
    %0 = vector.load %arg1[%c0, %c0_0] : memref<16x256xbf16, #tpu.memory_space<vmem>>, vector<16x256xbf16>
    %c0_1 = arith.constant 0 : index
    %c0_2 = arith.constant 0 : index
    %1 = vector.load %arg2[%c0_1, %c0_2] : memref<256x128xbf16, #tpu.memory_space<vmem>>, vector<256x128xbf16>
    %cst = arith.constant dense<0.000000e+00> : vector<16x128xf32>
    %2 = tpu.matmul %0, %1, %cst {dimension_numbers = #tpu.dot_dimension_numbers<[1], [0], [0], [1], [0, 0, 1, 1], [], []>} : vector<16x256xbf16>, vector<256x128xbf16>, vector<16x128xf32> -> vector<16x128xf32>
    %c0_3 = arith.constant 0 : index
    %c0_4 = arith.constant 0 : index
    %3 = vector.load %arg3[%c0_3, %c0_4] : memref<1x128xf32, #tpu.memory_space<vmem>>, vector<1x128xf32>
    %4 = vector.broadcast %3 : vector<1x128xf32> to vector<16x128xf32>
    %5 = arith.addf %2, %4 : vector<16x128xf32>
    %cst_5 = arith.constant dense<0.000000e+00> : vector<128xf32>
    %6 = vector.multi_reduction <add>, %5, %cst_5 [0] : vector<16x128xf32> to vector<128xf32>
    %7 = vector.shape_cast %6 : vector<128xf32> to vector<1x128xf32>
    %cst_6 = arith.constant 6.250000e-02 : f32
    %8 = vector.broadcast %cst_6 : f32 to vector<1x128xf32>
    %9 = arith.mulf %7, %8 : vector<1x128xf32>
    %10 = arith.mulf %5, %5 : vector<16x128xf32>
    %cst_7 = arith.constant dense<0.000000e+00> : vector<128xf32>
    %11 = vector.multi_reduction <add>, %10, %cst_7 [0] : vector<16x128xf32> to vector<128xf32>
    %12 = vector.shape_cast %11 : vector<128xf32> to vector<1x128xf32>
    %cst_8 = arith.constant 6.250000e-02 : f32
    %13 = vector.broadcast %cst_8 : f32 to vector<1x128xf32>
    %14 = arith.mulf %12, %13 : vector<1x128xf32>
    %15 = arith.mulf %9, %9 : vector<1x128xf32>
    %16 = arith.subf %14, %15 : vector<1x128xf32>
    %cst_9 = arith.constant 0.000000e+00 : f32
    %17 = vector.broadcast %cst_9 : f32 to vector<1x128xf32>
    %18 = arith.maximumf %16, %17 : vector<1x128xf32>
    %cst_10 = arith.constant 9.99999974E-6 : f32
    %19 = vector.broadcast %cst_10 : f32 to vector<1x128xf32>
    %20 = arith.addf %18, %19 : vector<1x128xf32>
    %21 = math.rsqrt %20 : vector<1x128xf32>
    %c0_11 = arith.constant 0 : index
    %c0_12 = arith.constant 0 : index
    %22 = vector.load %arg4[%c0_11, %c0_12] : memref<1x128xf32, #tpu.memory_space<vmem>>, vector<1x128xf32>
    %23 = arith.mulf %21, %22 : vector<1x128xf32>
    %24 = vector.broadcast %9 : vector<1x128xf32> to vector<16x128xf32>
    %25 = arith.subf %5, %24 : vector<16x128xf32>
    %26 = vector.broadcast %23 : vector<1x128xf32> to vector<16x128xf32>
    %27 = arith.mulf %25, %26 : vector<16x128xf32>
    %c0_13 = arith.constant 0 : index
    %c0_14 = arith.constant 0 : index
    %28 = vector.load %arg5[%c0_13, %c0_14] : memref<1x128xf32, #tpu.memory_space<vmem>>, vector<1x128xf32>
    %29 = vector.broadcast %28 : vector<1x128xf32> to vector<16x128xf32>
    %30 = arith.addf %27, %29 : vector<16x128xf32>
    %cst_15 = arith.constant 0.000000e+00 : f32
    %31 = vector.broadcast %cst_15 : f32 to vector<16x128xf32>
    %32 = arith.maximumf %30, %31 : vector<16x128xf32>
    %33 = arith.truncf %32 : vector<16x128xf32> to vector<16x128xbf16>
    %c0_16 = arith.constant 0 : index
    %c0_17 = arith.constant 0 : index
    %34 = vector.load %arg6[%c0_16, %c0_17] : memref<16x128xbf16, #tpu.memory_space<vmem>>, vector<16x128xbf16>
    tpu.vector_store %arg6[%c0_16, %c0_17], %33 {strides = array<i32>} : memref<16x128xbf16, #tpu.memory_space<vmem>>, vector<16x128xbf16>,
    return
  }
  func.func @transform_0(%arg0: i32) -> (i32, i32) {
    %c0_i32 = arith.constant 0 : i32
    %c0_i32_0 = arith.constant 0 : i32
    %c0_i32_1 = arith.constant 0 : i32
    return %c0_i32, %c0_i32_0 : i32, i32
  }
  func.func @transform_1(%arg0: i32) -> (i32, i32) {
    %c0_i32 = arith.constant 0 : i32
    %c0_i32_0 = arith.constant 0 : i32
    return %c0_i32, %arg0 : i32, i32
  }
  func.func @transform_2(%arg0: i32) -> (i32, i32) {
    %c0_i32 = arith.constant 0 : i32
    %c0_i32_0 = arith.constant 0 : i32
    return %c0_i32, %arg0 : i32, i32
  }
  func.func @transform_3(%arg0: i32) -> (i32, i32) {
    %c0_i32 = arith.constant 0 : i32
    %c0_i32_0 = arith.constant 0 : i32
    return %c0_i32, %arg0 : i32, i32
  }
  func.func @transform_4(%arg0: i32) -> (i32, i32) {
    %c0_i32 = arith.constant 0 : i32
    %c0_i32_0 = arith.constant 0 : i32
    return %c0_i32, %arg0 : i32, i32
  }
  func.func @transform_5(%arg0: i32) -> (i32, i32) {
    %c0_i32 = arith.constant 0 : i32
    %c0_i32_0 = arith.constant 0 : i32
    return %c0_i32, %arg0 : i32, i32
  }
}

</mosaic_0001>

<bundles_post_ra>
// kernel: tpu_custom_call.1
= control target key start
LH: loop header
LB: loop body
LE: loop exit
PB: predicated region body
PF: predicated region fallthrough
CT: control target
= control target key end

     0   :  { %10 = vsyncpa [#allocation3], 0  ;;  %s1202_s0 = inlined_call_operand.hbm [shape: bf16[16,256], index: 0, kind: input, shape index: {}]   ;;  %s1203_s1 = inlined_call_operand.hbm [shape: bf16[256,256], index: 1, kind: input, shape index: {}]   ;;  %s1204_s2 = inlined_call_operand.vmem [shape: f32[1,256], index: 2, kind: input, shape index: {}]   ;;  %s1205_s3 = inlined_call_operand.vmem [shape: f32[1,256], index: 3, kind: input, shape index: {}]   ;;  %s1206_s4 = inlined_call_operand.vmem [shape: f32[1,256], index: 4, kind: input, shape index: {}]   ;;  %s1207_s5 = inlined_call_operand.hbm [shape: bf16[16,256], index: 5, kind: output, shape index: {}]  }
   0x1   :  { %11 = vsyncpa [#allocation6], 0 }
   0x2   :  { %13 = vsyncpa [#allocation6 + $0x1], 0 }
   0x3   :  { %14 = vsyncpa [#allocation4], 0 }
   0x4   :  { %16 = vsyncpa [#allocation4 + $0x1], 0  ;;  %s981_s18 = smov 0   ;;  %s983_s19 = smov 0  }
   0x5   :  { %s985_s20 = smov 0   ;;  %s987_s21 = smov 0  }
   0x6 LB: > { %s1002_s22 = sadd.s32 4294967295, %s939_s21   ;;  %s667_s23 = sadd.s32 4294967294, %s939_s21   ;;  %s939_s21 = sphi %s987_s21, %s1229_s21   ;;  %s935_s20 = sphi %s985_s20, %s1228_s20   ;;  %s931_s19 = sphi %s983_s19, %s1227_s19   ;;  %s927_s18 = sphi %s981_s18, %s1226_s18  }
   0x7   : > { %s1006_s24 = sadd.s32 1, %s939_s21   ;;  %s50_s25 = sadd.s32 1, %s935_s20 }
   0x8   : > { %s47_s26 = ssub.s32 %s939_s21, %s1006_s24  ;;  %p57_p0 = scmp.ne.s32.totalorder %s935_s20, %s931_s19 }
   0x9   : > { %p48_p1 = scmp.eq.s32.totalorder %s47_s26, 0  ;;  %p58_p2 = scmp.eq.s32.totalorder %s939_s21, 0 }
   0xa   : > { %p63_p3 = scmp.ne.s32.totalorder %s931_s19, %s927_s18  ;;  %p1211_p4 = scmp.eq.s32.totalorder %s1002_s22, 0 }
   0xb   : > { %s1018_s27 = scalar_select %p48_p1, %s935_s20, %s50_s25  }
   0xc   : > { %p1020_p5 = por %p58_p2, %p57_p0  ;;  %p1026_p6 = por %p1211_p4, %p63_p3 }
   0xd   : > { %p165_p7 = scmp.eq.s32.totalorder %s1002_s22, 1  ;;  %p171_p8 = scmp.eq.s32.totalorder %s667_s23, 1 }
   0xe   : > { %s1213_s29 = scalar_select %p1026_p6, 1, 0 }
   0xf   : > { %p668_p9 = scmp.ge.s32.totalorder %s939_s21, 1  ;;  %p178_p10 = scmp.lt.s32.totalorder %s939_s21, 3 }
  0x10   : > { %p1033_p11 = por %p165_p7, %p57_p0  ;;  %p1037_p12 = por %p171_p8, %p63_p3 }
  0x11   : > { %p1041_p13 = pnand %p668_p9, %p178_p10  ;;  %s941_s8 = smov [#allocation2]  }
  0x12   : > { %s1214_s30 = scalar_select %p1033_p11, 1, 0 }
  0x13   : > { %s1215_s6 = scalar_select %p1037_p12, 1, 0 }
  0x14   : > { %s1216_s7 = scalar_select %p1041_p13, 1, 0 }
  0x15   : > { %p740_p1 = pneg %p1041_p13  ;;  %s190_s9 = sshll.u32 %s941_s8, 4  ;;  %s191_s9 = int_to_ptr.vmem [resolvable:$true] %s190_s9 }
  0x16   : > { %p753_p3 = scmp.lt.s32.totalorder %s939_s21, 2  ;;  %s204_s11 = sand.u32 1, %s935_s20  }
  0x17   : > { %p1049_p2 = pnand %p740_p1, %p1211_p4  ;;  %s828_s12 = scalar_lea.vmem %s191_s9, 256 }
  0x18   : > { %p829_p8 = scmp.ne.s32.totalorder %s191_s9, %s828_s12  ;;  %p836_p12 = scmp.lt.s32.totalorder %s191_s9, %s191_s9 }
  0x19   : > { %p819_p7 = pneg %p1049_p2  ;;  %p837_p11 = scmp.lt.s32.totalorder %s828_s12, %s828_s12 }
  0x1b   : > { %p831_p9 = pnand %p829_p8, %p819_p7  ;;  %p838_p6 = por %p837_p11, %p836_p12 }
  0x1d   : > { %p832_p10 = pneg %p831_p9 }
  0x1f   : > { %p839_p13 = pnand %p838_p6, %p832_p10 }
  0x21   : > { %842 = shalt.err (!%p839_p13)
}
  0x22   : > { %s942_s13 = smov 128   ;;  %s943_s14 = smov 8  }
  0x23   : > { %743 = dma.hbm_to_vmem [thread:$0]  (!%p1049_p2), %s1202_s0, 256, %s191_s9, [#allocation3], %s942_s13, %s942_s13, %s943_s14  }
  0x24   : > { %p1069_p1 = pnand %p753_p3, %p1020_p5  ;;  %s671_s23 = sshll.u32 %s204_s11, 7 }
  0x25   : > { %s672_s25 = sshll.u32 %s939_s21, 6  ;;  %s208_s10 = scalar_lea.vmem [#allocation5], %s671_s23 }
  0x26   : > { %s1077_s12 = scalar_lea.hbm %s1203_s1, %s672_s25  ;;  %s214_s15 = sshll.u32 %s208_s10, 4  ;;  %s1079_s15 = int_to_ptr.vmem [resolvable:$true] %s214_s15 }
  0x27   : > { %s1081_s28 = scalar_lea.sflag [#allocation6], %s204_s11  ;;  %s843_s9 = scalar_lea.hbm %s1077_s12, 2048 }
  0x28   : > { %p844_p5 = scmp.ne.s32.totalorder %s1077_s12, %s843_s9  ;;  %p845_p6 = pneg %p1069_p1 }
  0x29   : > { %s848_s25 = scalar_lea.hbm %s1203_s1, 4096  ;;  %p849_p13 = scmp.lt.s32.totalorder %s1077_s12, %s1203_s1 }
  0x2a   : > { %p846_p11 = pnand %p845_p6, %p844_p5  ;;  %p850_p2 = scmp.lt.s32.totalorder %s848_s25, %s843_s9 }
  0x2c   : > { %p847_p12 = pneg %p846_p11  ;;  %p851_p3 = por %p850_p2, %p849_p13 }
  0x2e   : > { %p852_p7 = pnand %p851_p3, %p847_p12 }
  0x30   : > { %855 = shalt.err (!%p852_p7)
}
  0x31   : > { %s856_s11 = scalar_lea.vmem %s1079_s15, 2048  ;;  %s944_s23 = smov [#allocation5]  }
  0x32   : > { %p857_p8 = scmp.ne.s32.totalorder %s1079_s15, %s856_s11  ;;  %s861_s10 = sshll.u32 %s944_s23, 4  ;;  %s862_s10 = int_to_ptr.vmem [resolvable:$false] %s861_s10 }
  0x33   : > { %s863_s14 = scalar_lea.vmem %s862_s10, 4096  ;;  %p864_p5 = scmp.lt.s32.totalorder %s1079_s15, %s862_s10 }
  0x34   : > { %p859_p9 = pnand %p857_p8, %p845_p6  ;;  %p865_p11 = scmp.lt.s32.totalorder %s863_s14, %s856_s11 }
  0x36   : > { %p860_p10 = pneg %p859_p9  ;;  %p866_p0 = por %p865_p11, %p864_p5 }
  0x38   : > { %p867_p4 = pnand %p866_p0, %p860_p10 }
  0x3a   : > { %870 = shalt.err (!%p867_p4)
}
  0x3b   : > { %s945_s9 = smov 64   ;;  %s946_s16 = smov 4  }
  0x3c   : > { %747 = dma.hbm_to_vmem [thread:$0]  (!%p1069_p1), %s1077_s12, 2048, %s1079_s15, %s1081_s28, %s942_s13, %s945_s9, %s946_s16  }
  0x3d   : > { %p1219_p6 = scmp.ne.s32.totalorder %s1216_s7, 0 }
  0x3e   : > { %p1220_p12 = scmp.eq.s32.totalorder (!%p1219_p6), %s1002_s22, 0 }
  0x3f   : > { %244 = sbr.rel (%p1219_p6) target bundleno = 374 (0x176), region = 40 }
  0x44   : > { %914 = dma.done.wait (%p1220_p12), [#allocation3], 256   ;;  %p1221_p13 = pmov %p1220_p12 }
  0x45   : > { %s1110_s25 = sand.u32 1, %s931_s19   ;;  %p1222_p4 = scmp.ne.s32.totalorder %s1213_s29, 0 }
  0x46   : > { %916 = vsyncadd (%p1221_p13), [#allocation3], 4294967040  ;;  %s675_s26 = sshll.u32 %s1110_s25, 7  ;;  %s251_s8 = scalar_lea.sflag [#allocation6], %s1110_s25 }
  0x47   : > { %s1114_s17 = scalar_lea.vmem [#allocation5], %s675_s26 }
  0x48   : > { %918 = dma.done.wait (%p1222_p4), %s251_s8, 2048  }
  0x49   : > { %920 = vsyncadd (%p1222_p4), %s251_s8, 4294965248  ;;  %v796_v0 = vld [vmem:[%s1114_s17 + $0x78] sm:$0xff]   ;;  %v798_v2 = vld [vmem:[%s1114_s17 + $0x70] sm:$0xff]   ;;  %p290_p0 = scmp.lt.s32.totalorder %s1002_s22, 1  ;;  %v515_v49 = vlaneseq  ;;  %s676_s9 = sshll.u32 %s1110_s25, 3 }
  0x4a   : > { %v797_v1 = vld [vmem:[%s1114_s17 + $0x38] sm:$0xff]   ;;  %710 = vmatprep.subr.bf16.mxu0 %v796_v0  ;;  %v799_v3 = vld [vmem:[%s1114_s17 + $0x30] sm:$0xff]   ;;  %v800_v4 = vld [vmem:[%s1114_s17 + $0x68] sm:$0xff]   ;;  %s700_s16 = sshll.u32 %s1002_s22, 6  ;;  %s289_s26 = scalar_lea.vmem [#allocation7], %s676_s9 }
  0x4b   : > { %711 = vmatpush3.bf16.msra.mxu0 %v797_v1  ;;  %v801_v5 = vld [vmem:[%s1114_s17 + $0x28] sm:$0xff]   ;;  %v802_v6 = vld [vmem:[%s1114_s17 + $0x60] sm:$0xff]   ;;  %v804_v8 = vld [vmem:[%s1114_s17 + $0x58] sm:$0xff]   ;;  %s1138_s29 = scalar_select %p290_p0, %s1002_s22, 1  ;;  %v516_v50 = vshrl.u32 %v515_v49, 7 }
  0x4c   : > { %712 = vmatprep.subr.bf16.mxu0 %v798_v2  ;;  %v803_v7 = vld [vmem:[%s1114_s17 + $0x20] sm:$0xff]   ;;  %v805_v9 = vld [vmem:[%s1114_s17 + $0x18] sm:$0xff]   ;;  %v806_v10 = vld [vmem:[%s1114_s17 + $0x50] sm:$0xff]   ;;  %s555_s8 = sshll.u32 %s289_s26, 4  ;;  %s543_s13 = scalar_lea.sflag [#allocation4], %s1110_s25  ;;  %s1159_s8 = int_to_ptr.vmem [resolvable:$true] %s555_s8 }
  0x4d   : > { %v814_v11 = vld [vmem:[#allocation2 + $0x4] ss:$8 sps:$4 sm:$0xff]   ;;  %v808_v13 = vld [vmem:[%s1114_s17 + $0x48] sm:$0xff]   ;;  %v810_v15 = vld [vmem:[%s1114_s17 + $0x40] sm:$0xff]   ;;  %s292_s12 = scalar_lea.vmem %s1204_s2, %s1138_s29  ;;  %s295_s11 = scalar_lea.vmem %s1205_s3, %s1138_s29  ;;  %v517_v52 = vsub.s32 0, %v516_v50 }
  0x4e   : > { %v807_v12 = vld [vmem:[%s1114_s17 + $0x10] sm:$0xff]   ;;  %479 = vmatprep.mubr.bf16.mxu0 %v814_v11  ;;  %v809_v14 = vld [vmem:[%s1114_s17 + $0x8] sm:$0xff]   ;;  %v811_v16 = vld [vmem:[%s1114_s17] sm:$0xff]   ;;  %s298_s14 = scalar_lea.vmem %s1206_s4, %s1138_s29  ;;  %s1157_s29 = scalar_lea.hbm %s1207_s5, %s700_s16 }
  0x4f   : > { %713 = vmatpush3.bf16.msra.mxu0 %v799_v3  ;;  %v812_v17 = vld [vmem:[#allocation2] ss:$8 sps:$4 sm:$0xff]   ;;  %s871_s22 = scalar_lea.vmem %s1159_s8, 128  ;;  %p1223_p2 = scmp.ne.s32.totalorder %s1214_s30, 0 }
  0x50   : > { %714 = vmatprep.subr.bf16.mxu0 %v800_v4  ;;  %v677_v21 = vld [vmem:[%s292_s12] ss:$0 sm:$0xff]  ;;  %p872_p1 = scmp.ne.s32.totalorder %s1159_s8, %s871_s22  ;;  %s947_s12 = smov [#allocation7]  }
  0x51   : > { %v511_v51 = vld [vmem:[%s295_s11] sm:$0x1]  ;;  %s875_s15 = sshll.u32 %s947_s12, 4  ;;  %s876_s15 = int_to_ptr.vmem [resolvable:$false] %s875_s15 }
  0x52   : > { %v696_v58 = vld [vmem:[%s298_s14] ss:$0 sm:$0xff]  ;;  %p873_p3 = pnand %p872_p1, %p1223_p2  ;;  %s877_s28 = scalar_lea.vmem %s876_s15, 256 }
  0x53   : > { %715 = vmatpush3.bf16.msra.mxu0 %v801_v5  ;;  %p878_p8 = scmp.lt.s32.totalorder %s1159_s8, %s876_s15  ;;  %p879_p9 = scmp.lt.s32.totalorder %s877_s28, %s871_s22 }
  0x54   : > { %716 = vmatprep.subr.bf16.mxu0 %v802_v6  ;;  %p874_p7 = pneg %p873_p3 }
  0x55   : > { %p880_p10 = por %p879_p9, %p878_p8 }
  0x57   : > { %717 = vmatpush3.bf16.msra.mxu0 %v803_v7  ;;  %p881_p5 = pnand %p880_p10, %p874_p7 }
  0x58   : > { %718 = vmatprep.subr.bf16.mxu0 %v804_v8 }
  0x5b   : > { %719 = vmatpush3.bf16.msra.mxu0 %v805_v9 }
  0x5c   : > { %720 = vmatprep.subr.bf16.mxu0 %v806_v10 }
  0x5f   : > { %721 = vmatpush3.bf16.msra.mxu0 %v807_v12 }
  0x60   : > { %722 = vmatprep.subr.bf16.mxu0 %v808_v13 }
  0x63   : > { %723 = vmatpush3.bf16.msra.mxu0 %v809_v14 }
  0x64   : > { %724 = vmatprep.subr.bf16.mxu0 %v810_v15 }
  0x67   : > { %725 = vmatpush3.bf16.msra.mxu0 %v811_v16 }
  0x6a   : > { %480 = vmatmul.mubr.bf16.vlgmr.msra.gmra.mxu0 %v812_v17 }
 0x12a   : > { %v726_v18 = vpop.f32.mrf.mxu0 }
 0x12c   : > { %v727_v19 = vpop.f32.mrf.mxu0 }
 0x12d   : > { %v728_v20 = vadd.f32 %v727_v19, %v726_v18 }
 0x12e   : > { %v729_v22 = vpop.f32.mrf.mxu0 }
 0x12f   : > { %v482_v24 = vadd.f32 %v728_v20, %v677_v21 }
 0x130   : > { %v730_v23 = vpop.f32.mrf.mxu0 }
 0x131   : > { %v731_v25 = vadd.f32 %v730_v23, %v729_v22  ;;  %v496_v27 = vmul.f32 %v482_v24, %v482_v24 }
 0x133   : > { %v485_v26 = vadd.f32 %v731_v25, %v677_v21 }
 0x135   : > { %v488_v28 = vadd.f32 %v485_v26, %v482_v24  ;;  %v497_v29 = vmul.f32 %v485_v26, %v485_v26 }
 0x137   : > { %v489_v30 = vrot.slane %v488_v28, 4  ;;  %v498_v31 = vadd.f32 %v497_v29, %v496_v27 }
 0x139   : > { %v490_v32 = vadd.f32 %v489_v30, %v488_v28  ;;  %v499_v33 = vrot.slane %v498_v31, 4 }
 0x13b   : > { %v491_v34 = vrot.slane %v490_v32, 2  ;;  %v500_v35 = vadd.f32 %v499_v33, %v498_v31 }
 0x13d   : > { %v492_v36 = vadd.f32 %v491_v34, %v490_v32  ;;  %v501_v37 = vrot.slane %v500_v35, 2 }
 0x13f   : > { %v493_v38 = vrot.slane %v492_v36, 1  ;;  %v502_v39 = vadd.f32 %v501_v37, %v500_v35 }
 0x141   : > { %v494_v40 = vadd.f32 %v493_v38, %v492_v36  ;;  %v503_v41 = vrot.slane %v502_v39, 1 }
 0x143   : > { %v495_v42 = vmul.f32 0.0625, %v494_v40  ;;  %v504_v43 = vadd.f32 %v503_v41, %v502_v39 }
 0x145   : > { %v505_v44 = vmul.f32 0.0625, %v504_v43  ;;  %v506_v45 = vmul.f32 %v495_v42, %v495_v42  ;;  %v513_v55 = vsub.f32 %v482_v24, %v495_v42  ;;  %v514_v56 = vsub.f32 %v485_v26, %v495_v42 }
 0x147   : > { %v507_v46 = vsub.f32 %v505_v44, %v506_v45 }
 0x149   : > { %v508_v47 = vmax.f32 %v507_v46, 0.0 }
 0x14b   : > { %v509_v48 = vadd.f32 1e-05, %v508_v47 }
 0x14d   : > { %815 = vrsqrt.f32 %v509_v48 }
 0x15a   : > { %v816_v53 = vpop.eup %815 }
 0x15b   : > { %v512_v54 = vmul.f32 %v816_v53, %v511_v51 }
 0x15d   : > { %v518_v57 = vrot.slane %v512_v54, %v517_v52 }
 0x15f   : > { %v519_v59 = vmul.f32 %v518_v57, %v513_v55  ;;  %v520_v60 = vmul.f32 %v518_v57, %v514_v56 }
 0x161   : > { %v528_v61 = vadd.f32 %v696_v58, %v519_v59  ;;  %v529_v62 = vadd.f32 %v696_v58, %v520_v60 }
 0x163   : > { %v530_v63 = vmax.f32 %v528_v61, 0.0  ;;  %v531_v0 = vmax.f32 %v529_v62, 0.0 }
 0x165   : > { %v708_v1 = vpack.c.bf16 %v531_v0, %v530_v63 }
 0x167   : > { %709 = vst [vmem:[%s289_s26] sm:$0xff] %v708_v1  }
 0x168   : > { %884 = shalt.err (!%p881_p5)
}
 0x169   : > { %s885_s11 = scalar_lea.hbm %s1157_s29, 128  ;;  %s889_s14 = scalar_lea.hbm %s1207_s5, 256 }
 0x16a   : > { %p886_p11 = scmp.ne.s32.totalorder %s1157_s29, %s885_s11  ;;  %p890_p13 = scmp.lt.s32.totalorder %s1157_s29, %s1207_s5 }
 0x16b   : > { %p891_p4 = scmp.lt.s32.totalorder %s889_s14, %s885_s11 }
 0x16c   : > { %p887_p6 = pnand %p886_p11, %p1223_p2 }
 0x16d   : > { %p892_p0 = por %p891_p4, %p890_p13 }
 0x16e   : > { %p888_p12 = pneg %p887_p6 }
 0x170   : > { %p893_p1 = pnand %p892_p0, %p888_p12 }
 0x172   : > { %896 = shalt.err (!%p893_p1)
}
 0x173   : > { %s948_s26 = smov 64   ;;  %s949_s17 = smov 128  }
 0x174   : > { %s950_s7 = smov 4  }
 0x175   : > { %738 = dma.vmem_to_hbm [thread:$0]  (%p1223_p2), %s1159_s8, 128, %s1157_s29, %s543_s13, %s948_s26, %s949_s17, %s950_s7  }
 0x176 PF: > { %s570_s22 = sand.u32 1, %s927_s18   ;;  %p1224_p3 = scmp.ne.s32.totalorder %s1215_s6, 0 }
 0x177   : > { %p1225_p7 = scmp.ge.s32.totalorder %s939_s21, 2  ;;  %s571_s12 = scalar_lea.sflag [#allocation4], %s570_s22 }
 0x179   : > { %p749_p8 = pnand %p1225_p7, %p1224_p3 }
 0x17b   : > { %p750_p9 = pneg %p749_p8 }
 0x17d   : > { %922 = dma.done.wait (%p750_p9), %s571_s12, 128  }
 0x17e   : > { %924 = vsyncadd (%p750_p9), %s571_s12, 4294967168  ;;  %p19_p10 = scmp.ge.s32.totalorder %s1006_s24, 4   ;;  %s1226_s18 = smov %s931_s19 }
 0x17f   : > { %s1227_s19 = smov %s935_s20  ;;  %s1228_s20 = smov %s1018_s27 }
 0x180   : > { %s1229_s21 = smov %s1006_s24  ;;  %21 = sbr.rel (!%p19_p10) target bundleno = 6 (0x6), region = 99 }
 0x185   :  { %576 = vsyncpa [#allocation3], 1 }
 0x186   :  { %578 = vsyncpa [#allocation3 + $0x1], 1 }
 0x187   :  { %579 = vsyncpa [#allocation6], 1 }
 0x188   :  { %581 = vsyncpa [#allocation6 + $0x1], 1 }
 0x189   :  { %582 = vsyncpa [#allocation4], 1 }
 0x18a   :  { %584 = vsyncpa [#allocation4 + $0x1], 1 }

</bundles_post_ra>
